<compile_context>
chip_gen: v7x
topology: tpu7x:2x2x1
jax: 0.10.0
libtpu: 0.0.40
codegen_flags: <defaults>
</compile_context>

<pallas_src>
import functools

import jax
import jax.numpy as jnp
import numpy as np
from jax.experimental import pallas as pl
from jax.experimental.pallas import tpu as pltpu

_VMEM_LIMIT = 48 * 1024 * 1024


# ----------------------------------------------------------------------------
# small static helpers
# ----------------------------------------------------------------------------
def _round_up(x, m):
    return ((x + m - 1) // m) * m


def _pick_tile(dim, prefs):
    for t in prefs:
        if dim % t == 0:
            return t
    return dim


def _pick_row_tile(m2):
    if m2 >= 512:
        return 256
    half = -(-m2 // 2)               # split into ~2 blocks (megacore)
    return max(8, _round_up(half, 8))


# ----------------------------------------------------------------------------
# Pallas kernels
# ----------------------------------------------------------------------------
def _matmul_bias_kernel(a_ref, w_ref, b_ref, *refs, relu, has_res):
    if has_res:
        res_ref, o_ref = refs
    else:
        (o_ref,) = refs
    acc = jnp.dot(a_ref[...], w_ref[...], preferred_element_type=jnp.float32)
    acc = acc + b_ref[...].astype(jnp.float32)
    if has_res:
        acc = acc + res_ref[...].astype(jnp.float32)
    if relu:
        acc = jnp.maximum(acc, 0.0)
    o_ref[...] = acc.astype(o_ref.dtype)


def _matmul_bias(a, w, bias, *, relu, residual=None, out_dtype=jnp.bfloat16):
    """C = A @ W + bias (+ residual) (+ReLU).  A:(M,K) bf16, W:(K,N) bf16."""
    M, K = a.shape
    N = w.shape[1]
    tm = _pick_tile(M, (256, 512, 128, 64, 32, 16, 8))
    tn = _pick_tile(N, (256, 512, 128))

    in_specs = [
        pl.BlockSpec((tm, K), lambda i, j: (i, 0)),
        pl.BlockSpec((K, tn), lambda i, j: (0, j)),
        pl.BlockSpec((1, tn), lambda i, j: (0, j)),
    ]
    args = [a, w, bias.reshape(1, N)]
    has_res = residual is not None
    if has_res:
        in_specs.append(pl.BlockSpec((tm, tn), lambda i, j: (i, j)))
        args.append(residual)

    return pl.pallas_call(
        functools.partial(_matmul_bias_kernel, relu=relu, has_res=has_res),
        out_shape=jax.ShapeDtypeStruct((M, N), out_dtype),
        grid_spec=pltpu.PrefetchScalarGridSpec(
            num_scalar_prefetch=0,
            grid=(M // tm, N // tn),
            in_specs=in_specs,
            out_specs=pl.BlockSpec((tm, tn), lambda i, j: (i, j)),
        ),
        compiler_params=pltpu.CompilerParams(
            dimension_semantics=("parallel", "parallel"),
            vmem_limit_bytes=_VMEM_LIMIT,
        ),
    )(*args)


def _conv_taps_kernel(x3_ref, w_ref, b_ref, o_ref, *, k, wpp, tm, relu):
    """Accumulate k row-shifted matmuls (kh taps); kw taps are packed in channels."""
    m = pl.program_id(0)
    cout = o_ref.shape[-1]
    acc = jnp.zeros((tm, cout), jnp.float32)
    for i in range(k):
        start = pl.multiple_of(m * tm + i * wpp, 8)       # tm, wpp are multiples of 8
        a = x3_ref[pl.ds(start, tm), :]
        acc = acc + jnp.dot(a, w_ref[i], preferred_element_type=jnp.float32)
    acc = acc + b_ref[...].astype(jnp.float32)
    if relu:
        acc = jnp.maximum(acc, 0.0)
    o_ref[...] = acc.astype(o_ref.dtype)


def _conv_rowshift(x3, w, bias, *, k, wpp, tm, m2o, relu, out_dtype=jnp.bfloat16):
    L0, KC = x3.shape
    cout = w.shape[-1]
    return pl.pallas_call(
        functools.partial(_conv_taps_kernel, k=k, wpp=wpp, tm=tm, relu=relu),
        out_shape=jax.ShapeDtypeStruct((m2o, cout), out_dtype),
        grid_spec=pltpu.PrefetchScalarGridSpec(
            num_scalar_prefetch=0,
            grid=(m2o // tm,),
            in_specs=[
                pl.BlockSpec((L0, KC), lambda i: (0, 0)),        # resident activation
                pl.BlockSpec((k, KC, cout), lambda i: (0, 0, 0)),  # resident weights
                pl.BlockSpec((1, cout), lambda i: (0, 0)),
            ],
            out_specs=pl.BlockSpec((tm, cout), lambda i: (i, 0)),
        ),
        compiler_params=pltpu.CompilerParams(
            dimension_semantics=("parallel",),
            vmem_limit_bytes=_VMEM_LIMIT,
        ),
    )(x3, w, bias.reshape(1, cout))


def _max9_kernel(*refs):
    o_ref = refs[-1]
    m = refs[0][...]
    for r in refs[1:-1]:
        m = jnp.maximum(m, r[...])
    o_ref[...] = m


def _gap_kernel(x_ref, o_ref):
    o_ref[...] = jnp.mean(x_ref[...].astype(jnp.float32), axis=1)


# ----------------------------------------------------------------------------
# Op wrappers (jitted per shape / static-config)
# ----------------------------------------------------------------------------
@functools.partial(jax.jit, static_argnames=("stride", "relu"))
def conv1x1_bn(x, w3, b, residual=None, *, stride=1, relu=True):
    """1x1 conv (+BN folded) (+fused residual add) (+ReLU).  x: NHWC bf16."""
    if stride > 1:
        x = x[:, ::stride, ::stride, :]
    N, H, W, Cin = x.shape
    cout = w3.shape[-1]
    a = x.reshape(N * H * W, Cin)
    res2 = None if residual is None else residual.reshape(N * H * W, cout)
    y = _matmul_bias(a, w3.reshape(Cin, cout), b, relu=relu, residual=res2)
    return y.reshape(N, H, W, cout)


@functools.partial(jax.jit, static_argnames=("k", "stride", "pad", "relu"))
def conv_spatial_bn(x, w, b, *, k, stride, pad, relu=True):
    """k x k conv (k=3 here) without full im2col: kw taps packed into channels,
    kh taps handled with aligned row shifts inside the Pallas kernel."""
    N, H, W, Cin = x.shape
    cout = w.shape[-1]
    assert w.shape[0] == k and w.shape[1] == k * Cin
    Ho = (H + 2 * pad - k) // stride + 1
    Wo = (W + 2 * pad - k) // stride + 1
    Hp = H + 2 * pad
    Wpp = _round_up(W + 2 * pad, 8)

    xp = jnp.pad(x, ((0, 0), (pad, pad), (pad, Wpp - W - pad), (0, 0)))
    xpw = jnp.pad(xp, ((0, 0), (0, 0), (0, k - 1), (0, 0)))
    # pack the kw taps into channels: x3[n,a,b, j*Cin+c] = x_pad[n, a, b+j, c]
    x3 = jnp.concatenate([xpw[:, :, j:j + Wpp, :] for j in range(k)], axis=-1)

    M2 = N * Hp * Wpp
    tm = _pick_row_tile(M2)
    m2o = _round_up(M2, tm)
    L0 = m2o + (k - 1) * Wpp
    x3 = x3.reshape(M2, k * Cin)
    x3 = jnp.pad(x3, ((0, L0 - M2), (0, 0)))

    out_full = _conv_rowshift(x3, w, b, k=k, wpp=Wpp, tm=tm, m2o=m2o, relu=relu)
    out = out_full[:M2].reshape(N, Hp, Wpp, cout)
    out = out[:, 0:(Ho - 1) * stride + 1:stride, 0:(Wo - 1) * stride + 1:stride, :]
    return out


def _im2col(x, k, stride, pad):
    N, H, W, C = x.shape
    Ho = (H + 2 * pad - k) // stride + 1
    Wo = (W + 2 * pad - k) // stride + 1
    xp = jnp.pad(x, ((0, 0), (pad, pad), (pad, pad), (0, 0)))
    cols = [
        jax.lax.slice(
            xp,
            (0, i, j, 0),
            (N, i + (Ho - 1) * stride + 1, j + (Wo - 1) * stride + 1, C),
            (1, stride, stride, 1),
        )
        for i in range(k)
        for j in range(k)
    ]
    col = jnp.stack(cols, axis=3)  # (N, Ho, Wo, k*k, C)
    return col.reshape(N * Ho * Wo, k * k * C), (N, Ho, Wo)


@jax.jit
def conv1_7x7_s2(x, w3, b):
    """Stem conv: 7x7/s2/p3 on 3 channels -- single conv, small im2col is cheapest."""
    cout = w3.shape[-1]
    col, (N, Ho, Wo) = _im2col(x, 7, 2, 3)
    y = _matmul_bias(col, w3.reshape(-1, cout), b, relu=True)
    return y.reshape(N, Ho, Wo, cout)


@jax.jit
def maxpool_3x3_s2_p1(x):
    N, H, W, C = x.shape
    k, s, p = 3, 2, 1
    Ho = (H + 2 * p - k) // s + 1
    Wo = (W + 2 * p - k) // s + 1
    xp = jnp.pad(x, ((0, 0), (p, p), (p, p), (0, 0)), constant_values=-jnp.inf)
    wins = [
        jax.lax.slice(
            xp,
            (0, i, j, 0),
            (N, i + (Ho - 1) * s + 1, j + (Wo - 1) * s + 1, C),
            (1, s, s, 1),
        ).reshape(N * Ho * Wo, C)
        for i in range(k)
        for j in range(k)
    ]
    M = N * Ho * Wo
    tm = _pick_tile(M, (256, 512, 128, 64, 32, 16, 8))
    out = pl.pallas_call(
        _max9_kernel,
        out_shape=jax.ShapeDtypeStruct((M, C), x.dtype),
        grid_spec=pltpu.PrefetchScalarGridSpec(
            num_scalar_prefetch=0,
            grid=(M // tm,),
            in_specs=[pl.BlockSpec((tm, C), lambda i: (i, 0))] * (k * k),
            out_specs=pl.BlockSpec((tm, C), lambda i: (i, 0)),
        ),
        compiler_params=pltpu.CompilerParams(
            dimension_semantics=("parallel",),
            vmem_limit_bytes=_VMEM_LIMIT,
        ),
    )(*wins)
    return out.reshape(N, Ho, Wo, C)


@jax.jit
def global_avgpool(x):
    N, H, W, C = x.shape
    xr = x.reshape(N, H * W, C)
    tc = _pick_tile(C, (512, 256, 128))
    return pl.pallas_call(
        _gap_kernel,
        out_shape=jax.ShapeDtypeStruct((N, C), jnp.float32),
        grid_spec=pltpu.PrefetchScalarGridSpec(
            num_scalar_prefetch=0,
            grid=(C // tc,),
            in_specs=[pl.BlockSpec((N, H * W, tc), lambda c: (0, 0, c))],
            out_specs=pl.BlockSpec((N, tc), lambda c: (0, c)),
        ),
        compiler_params=pltpu.CompilerParams(
            dimension_semantics=("parallel",),
            vmem_limit_bytes=_VMEM_LIMIT,
        ),
    )(xr)


@jax.jit
def fc_heads(feat, w, b):
    # feat (N, 2048) f32; w (2048, 256) bf16 (lane-padded); b (256,) f32
    return _matmul_bias(feat.astype(jnp.bfloat16), w, b, relu=False,
                        out_dtype=jnp.float32)


# ----------------------------------------------------------------------------
# Deterministic parameter construction (ResNet-101: blocks = 3, 4, 23, 3)
# ----------------------------------------------------------------------------
def _conv_bn_params(key, cin, cout, k, eps=1e-5):
    wkey, bkey = jax.random.split(key)
    fan_in = cin * k * k
    w = jax.random.normal(wkey, (cout, cin, k, k), jnp.float32) * np.sqrt(2.0 / fan_in)
    gamma = jnp.ones((cout,), jnp.float32)
    beta = jax.random.normal(bkey, (cout,), jnp.float32) * 0.01
    mean = jnp.zeros((cout,), jnp.float32)
    var = jnp.ones((cout,), jnp.float32)
    scale = gamma / jnp.sqrt(var + eps)
    wf = w * scale[:, None, None, None]
    bf = beta - mean * scale
    # (Cout, Cin, kh, kw) -> (kh, kw, Cin, Cout) -> (kh, kw*Cin, Cout)
    wm = jnp.transpose(wf, (2, 3, 1, 0)).reshape(k, k * cin, cout).astype(jnp.bfloat16)
    return {"w": wm, "b": bf.astype(jnp.float32)}


def _linear_params(key, nin, nout):
    wkey, bkey = jax.random.split(key)
    bound = 1.0 / np.sqrt(nin)
    w = jax.random.uniform(wkey, (nin, nout), jnp.float32, -bound, bound)
    b = jax.random.uniform(bkey, (nout,), jnp.float32, -bound, bound)
    return w, b


def build_posenet_params(key, angles_bin=3, max_angle=99):
    keys = iter(jax.random.split(key, 256))
    params = {"conv1": _conv_bn_params(next(keys), 3, 64, 7)}
    inplanes = 64
    layers = []
    for planes, nblocks, stride in [(64, 3, 1), (128, 4, 2), (256, 23, 2), (512, 3, 2)]:
        blocks = []
        for bi in range(nblocks):
            s = stride if bi == 0 else 1
            blk = {
                "conv1": _conv_bn_params(next(keys), inplanes, planes, 1),
                "conv2": _conv_bn_params(next(keys), planes, planes, 3),
                "conv3": _conv_bn_params(next(keys), planes, planes * 4, 1),
                "stride": s,
            }
            if s != 1 or inplanes != planes * 4:
                blk["downsample"] = _conv_bn_params(next(keys), inplanes, planes * 4, 1)
            inplanes = planes * 4
            blocks.append(blk)
        layers.append(blocks)
    params["layers"] = layers

    num_bins = max_angle * 2 // angles_bin              # 66
    feat = 512 * 4                                      # Bottleneck.expansion = 4
    wy, by = _linear_params(next(keys), feat, num_bins)
    wp, bp = _linear_params(next(keys), feat, num_bins)
    wr, br = _linear_params(next(keys), feat, num_bins)
    w = jnp.concatenate([wy, wp, wr], axis=1)           # (2048, 198)
    b = jnp.concatenate([by, bp, br], axis=0)
    npad = _round_up(3 * num_bins, 128) - 3 * num_bins  # pad heads to lane-dense 256
    params["fc_w"] = jnp.pad(w, ((0, 0), (0, npad))).astype(jnp.bfloat16)
    params["fc_b"] = jnp.pad(b, (0, npad)).astype(jnp.float32)
    params["num_bins"] = num_bins
    return params


# ----------------------------------------------------------------------------
# Forward pass
# ----------------------------------------------------------------------------
def bottleneck(x, blk):
    s = blk["stride"]
    out = conv1x1_bn(x, blk["conv1"]["w"], blk["conv1"]["b"], relu=True)
    out = conv_spatial_bn(out, blk["conv2"]["w"], blk["conv2"]["b"],
                          k=3, stride=s, pad=1, relu=True)
    if "downsample" in blk:
        identity = conv1x1_bn(x, blk["downsample"]["w"], blk["downsample"]["b"],
                              stride=s, relu=False)
    else:
        identity = x
    # conv3 with the residual add + ReLU fused into the matmul kernel
    out = conv1x1_bn(out, blk["conv3"]["w"], blk["conv3"]["b"],
                     residual=identity, relu=True)
    return out


def posenet_forward(params, x_nchw):
    # layout: input NCHW f32 -> NHWC bf16 for all internal kernels.
    x = jnp.transpose(x_nchw, (0, 2, 3, 1)).astype(jnp.bfloat16)
    x = conv1_7x7_s2(x, params["conv1"]["w"], params["conv1"]["b"])
    x = maxpool_3x3_s2_p1(x)
    for blocks in params["layers"]:
        for blk in blocks:
            x = bottleneck(x, blk)
    feat = global_avgpool(x)                 # (N, 2048) f32 == x.view(x.size(0), -1)
    out = fc_heads(feat, params["fc_w"], params["fc_b"])   # (N, 256) f32 (padded)
    nb = params["num_bins"]
    return out[:, :nb], out[:, nb:2 * nb], out[:, 2 * nb:3 * nb]


# ----------------------------------------------------------------------------
if __name__ == "__main__":
    key = jax.random.PRNGKey(0)
    pkey, xkey = jax.random.split(key)
    params = build_posenet_params(pkey)

    # Small input consistent with a ResNet backbone: batch=2, 3 channels, 64x64.
    x = jax.random.normal(xkey, (2, 3, 64, 64), jnp.float32)

    yaw, pitch, roll = posenet_forward(params, x)
    jax.block_until_ready((yaw, pitch, roll))

    assert yaw.shape == (2, 66) and pitch.shape == (2, 66) and roll.shape == (2, 66)
    print("KERNEL_OK")
</pallas_src>

<mosaic_0001>
module attributes {stable_mosaic.version = 11 : i64} {
  func.func @_matmul_bias_kernel(%arg0: i32, %arg1: i32, %arg2: memref<256x147xbf16, #tpu.memory_space<vmem>>, %arg3: memref<147x64xbf16, #tpu.memory_space<vmem>>, %arg4: memref<1x64xf32, #tpu.memory_space<vmem>>, %arg5: memref<256x64xbf16, #tpu.memory_space<vmem>>) attributes {dimension_semantics = [#tpu.dimension_semantics<parallel>, #tpu.dimension_semantics<parallel>], iteration_bounds = array<i64: 8, 1>, scalar_prefetch = 0 : i64, scratch_operands = 0 : i64, tpu.core_type = #tpu.core_type<tc>, window_params = [{transform_indices = @transform_0, window_bounds = array<i64: 256, 147>}, {transform_indices = @transform_1, window_bounds = array<i64: 147, 64>}, {transform_indices = @transform_2, window_bounds = array<i64: 1, 64>}, {transform_indices = @transform_3, window_bounds = array<i64: 256, 64>}]} {
    %c0 = arith.constant 0 : index
    %c0_0 = arith.constant 0 : index
    %0 = vector.load %arg2[%c0, %c0_0] : memref<256x147xbf16, #tpu.memory_space<vmem>>, vector<256x147xbf16>
    %c0_1 = arith.constant 0 : index
    %c0_2 = arith.constant 0 : index
    %1 = vector.load %arg3[%c0_1, %c0_2] : memref<147x64xbf16, #tpu.memory_space<vmem>>, vector<147x64xbf16>
    %cst = arith.constant dense<0.000000e+00> : vector<256x64xf32>
    %2 = tpu.matmul %0, %1, %cst {dimension_numbers = #tpu.dot_dimension_numbers<[1], [0], [0], [1], [0, 0, 1, 1], [], []>} : vector<256x147xbf16>, vector<147x64xbf16>, vector<256x64xf32> -> vector<256x64xf32>
    %c0_3 = arith.constant 0 : index
    %c0_4 = arith.constant 0 : index
    %3 = vector.load %arg4[%c0_3, %c0_4] : memref<1x64xf32, #tpu.memory_space<vmem>>, vector<1x64xf32>
    %4 = vector.broadcast %3 : vector<1x64xf32> to vector<256x64xf32>
    %5 = arith.addf %2, %4 : vector<256x64xf32>
    %cst_5 = arith.constant 0.000000e+00 : f32
    %6 = vector.broadcast %cst_5 : f32 to vector<256x64xf32>
    %7 = arith.maximumf %5, %6 : vector<256x64xf32>
    %8 = arith.truncf %7 : vector<256x64xf32> to vector<256x64xbf16>
    %c0_6 = arith.constant 0 : index
    %c0_7 = arith.constant 0 : index
    %9 = vector.load %arg5[%c0_6, %c0_7] : memref<256x64xbf16, #tpu.memory_space<vmem>>, vector<256x64xbf16>
    tpu.vector_store %arg5[%c0_6, %c0_7], %8 {strides = array<i32>} : memref<256x64xbf16, #tpu.memory_space<vmem>>, vector<256x64xbf16>,
    return
  }
  func.func @transform_0(%arg0: i32, %arg1: i32) -> (i32, i32) {
    %c0_i32 = arith.constant 0 : i32
    %c0_i32_0 = arith.constant 0 : i32
    return %arg0, %c0_i32 : i32, i32
  }
  func.func @transform_1(%arg0: i32, %arg1: i32) -> (i32, i32) {
    %c0_i32 = arith.constant 0 : i32
    %c0_i32_0 = arith.constant 0 : i32
    return %c0_i32, %arg1 : i32, i32
  }
  func.func @transform_2(%arg0: i32, %arg1: i32) -> (i32, i32) {
    %c0_i32 = arith.constant 0 : i32
    %c0_i32_0 = arith.constant 0 : i32
    return %c0_i32, %arg1 : i32, i32
  }
  func.func @transform_3(%arg0: i32, %arg1: i32) -> (i32, i32) {
    %c0_i32 = arith.constant 0 : i32
    return %arg0, %arg1 : i32, i32
  }
}

</mosaic_0001>

<bundles_post_ra>
// kernel: conv1_7x7_s2.1
= control target key start
LH: loop header
LB: loop body
LE: loop exit
PB: predicated region body
PF: predicated region fallthrough
CT: control target
= control target key end

     0   :  { %8 = vsyncpa [#allocation3], 0  ;;  %s1689_s0 = inlined_call_operand.vmem [shape: bf16[2048,147], index: 0, kind: input, shape index: {}]   ;;  %s1690_s1 = inlined_call_operand.vmem [shape: bf16[147,64], index: 1, kind: input, shape index: {}]   ;;  %s1691_s2 = inlined_call_operand.vmem [shape: f32[1,64], index: 2, kind: input, shape index: {}]   ;;  %s1692_s3 = inlined_call_operand.hbm [shape: bf16[2048,64], index: 3, kind: output, shape index: {}]  }
   0x1   :  { %10 = vsyncpa [#allocation3 + $0x1], 0  ;;  %s1387_s12 = smov 0   ;;  %s1389_s13 = smov 0  }
   0x2   :  { %s1391_s14 = smov 0   ;;  %s1393_s15 = smov 0  }
   0x3   :  { %s1395_s16 = smov 0   ;;  %s1397_s17 = smov 0  }
   0x4 LB: > { %s1004_s18 = sadd.s32 4294967295, %s1360_s17   ;;  %s1005_s19 = sadd.s32 4294967294, %s1360_s17   ;;  %s1360_s17 = sphi %s1397_s17, %s16_s17   ;;  %s1356_s16 = sphi %s1395_s16, %s1699_s16   ;;  %s1352_s15 = sphi %s1393_s15, %s1698_s15   ;;  %s1348_s14 = sphi %s1391_s14, %s1697_s14   ;;  %s1344_s13 = sphi %s1389_s13, %s1696_s13   ;;  %s1340_s12 = sphi %s1387_s12, %s1695_s12  }
   0x5   : > { %s28_s20 = sadd.s32 1, %s1356_s16  ;;  %s115_s21 = sadd.s32 1, %s1348_s14 }
   0x6   : > { %p30_p0 = scmp.ge.s32.totalorder %s28_s20, 8  ;;  %p125_p1 = scmp.ne.s32.totalorder %s1348_s14, %s1344_s13 }
   0x7   : > { %p126_p2 = scmp.eq.s32.totalorder %s1004_s18, 7  ;;  %p131_p3 = scmp.ne.s32.totalorder %s1344_s13, %s1340_s12 }
   0x8   : > { %s1701_s20 = smov (%p30_p0, %s28_s20), 0  ;;  %p132_p5 = scmp.eq.s32.totalorder %s1005_s19, 7 }
   0x9   : > { %p1427_p4 = por %p126_p2, %p125_p1  ;;  %s110_s23 = ssub.s32 %s1356_s16, %s1701_s20 }
   0xa   : > { %p1010_p6 = scmp.ge.s32.totalorder %s1360_s17, 1  ;;  %p113_p7 = scmp.eq.s32.totalorder %s110_s23, 0 }
   0xb   : > { %p1434_p8 = por %p132_p5, %p131_p3  ;;  %p173_p9 = scmp.lt.s32.totalorder %s1360_s17, 9 }
   0xc   : > { %s1440_s25 = scalar_select %p113_p7, %s1348_s14, %s115_s21  }
   0xd   : > { %p174_p10 = pnand %p1010_p6, %p173_p9 }
   0xe   : > { %v1224_v0 = vld [vmem:[%s1690_s1] sm:$0xff] (!%p174_p10)   ;;  %v1362_v1 = vmov (!%p174_p10), 0   ;;  %v1225_v2 = vld [vmem:[%s1690_s1 + $0x8] sm:$0xff] (!%p174_p10)   ;;  %v1226_v3 = vld [vmem:[%s1690_s1 + $0x10] sm:$0xff] (!%p174_p10)   ;;  %s1012_s5 = sshll.u32 (!%p174_p10), %s1352_s15, 5  ;;  %vm480_vm0 = vcmask (!%p174_p10), 154624  }
   0xf   : > { %177 = sbr.rel (%p174_p10) target bundleno = 346 (0x15a), region = 32  ;;  %536 = vmatprep.subr.bf16.mxu0 (!%p174_p10), %v1362_v1  ;;  %1145 = vmatprep.subr.bf16.mxu1 (!%p174_p10), %v1362_v1  ;;  %p206_p11 = scmp.lt.s32.totalorder (!%p174_p10), %s1012_s5, 255  ;;  %v1227_v4 = vld [vmem:[%s1690_s1 + $0x18] sm:$0xff] (!%p174_p10)   ;;  %v1228_v5 = vld [vmem:[%s1690_s1 + $0x20] sm:$0xff] (!%p174_p10)   ;;  %v1229_v8 = vld [vmem:[%s1690_s1 + $0x28] sm:$0xff] (!%p174_p10)   ;;  %vm529_vm1 = vcmask (!%p174_p10), 1040384  }
  0x10   : > { %537 = vmatpush1.bf16.msra.mxu0 (!%p174_p10), %v1224_v0  ;;  %1155 = vmatpush1.bf16.msra.mxu1 (!%p174_p10), %v1224_v0  ;;  %v1230_v9 = vld [vmem:[%s1690_s1 + $0x30] sm:$0xff] (!%p174_p10)   ;;  %v1231_v10 = vld [vmem:[%s1690_s1 + $0x38] sm:$0xff] (!%p174_p10)   ;;  %vm530_vm2 = vcmask (!%p174_p10), 1041408   ;;  %v1363_v11 = vmov (!%p174_p10), 65535   ;;  %v1232_v13 = vld [vmem:[%s1690_s1 + $0x40] sm:$0xff] (!%p174_p10)   ;;  %s202_s7 = sand.u32 (!%p174_p10), 1, %s1344_s13  }
  0x11   : > { %538 = vmatprep.subr.bf16.mxu0 (!%p174_p10), %v1362_v1  ;;  %1146 = vmatprep.subr.bf16.mxu1 (!%p174_p10), %v1362_v1  ;;  %v531_v12 = vsel (!%p174_p10), %vm529_vm1, 4294967295, %v1363_v11  ;;  %v1233_v14 = vld [vmem:[%s1690_s1 + $0x48] ss:$0 sps:$4 sm:$0x33] (!%p174_p10)   ;;  %v1530_v47 = vld [vmem:[%s1691_s2] ss:$0 sm:$0xff] (!%p174_p10) }
  0x12   : > { %v532_v15 = vsel (!%p174_p10), %vm530_vm2, %v531_v12, 0  ;;  %s1011_s10 = sshll.u32 (!%p174_p10), %s202_s7, 7  ;;  %vm857_vm3 = vcmask (!%p174_p10), 519168   ;;  %s1144_s18 = sshll.u32 (!%p174_p10), %s1352_s15, 11 }
  0x13   : > { %v534_v16 = vand.u32 (!%p174_p10), %v1233_v14, %v532_v15  ;;  %s1629_s26 = scalar_lea.hbm (!%p174_p10), %s1692_s3, %s1144_s18  ;;  %s1643_s15 = scalar_lea.sflag (!%p174_p10), [#allocation3], %s202_s7 }
  0x14   : > { %539 = vmatpush1.bf16.msra.mxu0 (!%p174_p10), %v1225_v2  ;;  %1156 = vmatpush1.bf16.msra.mxu1 (!%p174_p10), %v1225_v2  ;;  %s1364_s28 = smov (!%p174_p10), [#allocation2]  }
  0x15   : > { %540 = vmatprep.subr.bf16.mxu0 (!%p174_p10), %v1362_v1  ;;  %1147 = vmatprep.subr.bf16.mxu1 (!%p174_p10), %v1362_v1  ;;  %s1286_s29 = sshll.u32 (!%p174_p10), %s1364_s28, 4  ;;  %s1287_s29 = int_to_ptr.vmem [resolvable:$false] %s1286_s29 }
  0x16   : > { %s1703_s5 = smov (!%p206_p11, %s1012_s5), 255  ;;  %s1288_s30 = scalar_lea.vmem %s1287_s29, 4096 }
  0x17   : > { %s1111_s8 = sshll.u32 %s1703_s5, 3 }
  0x18   : > { %541 = vmatpush1.bf16.msra.mxu0 %v1226_v3  ;;  %1157 = vmatpush1.bf16.msra.mxu1 %v1226_v3  ;;  %s1458_s11 = scalar_lea.vmem %s1689_s0, %s1111_s8 }
  0x19   : > { %542 = vmatprep.subr.bf16.mxu0 %v1362_v1  ;;  %1148 = vmatprep.subr.bf16.mxu1 %v1362_v1  ;;  %v1236_v6 = vld [vmem:[%s1458_s11 + $0x4] ss:$8 sps:$4 sm:$0xff]   ;;  %v1234_v17 = vld [vmem:[%s1458_s11] ss:$8 sps:$4 sm:$0xff]   ;;  %v1240_v19 = vld [vmem:[%s1458_s11 + $0x14] ss:$8 sps:$4 sm:$0xff]  }
  0x1a   : > { %v1239_v7 = vld [vmem:[%s1458_s11 + $0x84] ss:$8 sps:$4 sm:$0xff]   ;;  %1058 = vmatprep.mubr.msk.bf16.mxu0 %vm480_vm0, %v1236_v6  ;;  %v1237_v18 = vld [vmem:[%s1458_s11 + $0x80] ss:$8 sps:$4 sm:$0xff]   ;;  %v1242_v20 = vld [vmem:[%s1458_s11 + $0x94] ss:$8 sps:$4 sm:$0xff]  }
  0x1b   : > { %1066 = vmatprep.mubr.msk.bf16.mxu1 %vm480_vm0, %v1239_v7  ;;  %v1244_v21 = vld [vmem:[%s1458_s11 + $0x10] ss:$8 sps:$4 sm:$0xff]   ;;  %v1246_v23 = vld [vmem:[%s1458_s11 + $0x24] ss:$8 sps:$4 sm:$0xff]   ;;  %v1250_v25 = vld [vmem:[%s1458_s11 + $0x20] ss:$8 sps:$4 sm:$0xff]  }
  0x1c   : > { %543 = vmatpush1.bf16.msra.mxu0 %v1227_v4  ;;  %1158 = vmatpush1.bf16.msra.mxu1 %v1227_v4  ;;  %v1245_v22 = vld [vmem:[%s1458_s11 + $0x90] ss:$8 sps:$4 sm:$0xff]   ;;  %v1248_v24 = vld [vmem:[%s1458_s11 + $0xa4] ss:$8 sps:$4 sm:$0xff]   ;;  %v1251_v26 = vld [vmem:[%s1458_s11 + $0xa0] ss:$8 sps:$4 sm:$0xff]  }
  0x1d   : > { %544 = vmatprep.subr.bf16.mxu0 %v1362_v1  ;;  %1149 = vmatprep.subr.bf16.mxu1 %v1362_v1  ;;  %v1252_v27 = vld [vmem:[%s1458_s11 + $0x34] ss:$8 sps:$4 sm:$0xff]   ;;  %v1256_v29 = vld [vmem:[%s1458_s11 + $0x30] ss:$8 sps:$4 sm:$0xff]   ;;  %v1258_v31 = vld [vmem:[%s1458_s11 + $0x44] ss:$8 sps:$4 sm:$0xff]  }
  0x1e   : > { %v1254_v28 = vld [vmem:[%s1458_s11 + $0xb4] ss:$8 sps:$4 sm:$0xff]   ;;  %v1257_v30 = vld [vmem:[%s1458_s11 + $0xb0] ss:$8 sps:$4 sm:$0xff]   ;;  %v1260_v32 = vld [vmem:[%s1458_s11 + $0xc4] ss:$8 sps:$4 sm:$0xff]  }
  0x1f   : > { %v1262_v33 = vld [vmem:[%s1458_s11 + $0x40] ss:$8 sps:$4 sm:$0xff]   ;;  %v1264_v35 = vld [vmem:[%s1458_s11 + $0x54] ss:$8 sps:$4 sm:$0xff]   ;;  %v1268_v37 = vld [vmem:[%s1458_s11 + $0x50] ss:$8 sps:$4 sm:$0xff]  }
  0x20   : > { %545 = vmatpush1.bf16.msra.mxu0 %v1228_v5  ;;  %1159 = vmatpush1.bf16.msra.mxu1 %v1228_v5  ;;  %v1263_v34 = vld [vmem:[%s1458_s11 + $0xc0] ss:$8 sps:$4 sm:$0xff]   ;;  %v1266_v36 = vld [vmem:[%s1458_s11 + $0xd4] ss:$8 sps:$4 sm:$0xff]   ;;  %v1269_v38 = vld [vmem:[%s1458_s11 + $0xd0] ss:$8 sps:$4 sm:$0xff]  }
  0x21   : > { %546 = vmatprep.subr.bf16.mxu0 %v1362_v1  ;;  %1150 = vmatprep.subr.bf16.mxu1 %v1362_v1  ;;  %v1270_v39 = vld [vmem:[%s1458_s11 + $0x64] ss:$8 sps:$4 sm:$0xff]   ;;  %v1274_v41 = vld [vmem:[%s1458_s11 + $0x60] ss:$8 sps:$4 sm:$0xff]   ;;  %v1276_v43 = vld [vmem:[%s1458_s11 + $0x74] ss:$8 sps:$4 sm:$0xff]  }
  0x22   : > { %v1272_v40 = vld [vmem:[%s1458_s11 + $0xe4] ss:$8 sps:$4 sm:$0xff]   ;;  %v1275_v42 = vld [vmem:[%s1458_s11 + $0xe0] ss:$8 sps:$4 sm:$0xff]   ;;  %v1278_v44 = vld [vmem:[%s1458_s11 + $0xf4] ss:$8 sps:$4 sm:$0xff]  }
  0x23   : > { %v1280_v45 = vld [vmem:[%s1458_s11 + $0x70] ss:$8 sps:$4 sm:$0xff]  }
  0x24   : > { %547 = vmatpush1.bf16.msra.mxu0 %v1229_v8  ;;  %1160 = vmatpush1.bf16.msra.mxu1 %v1229_v8  ;;  %v1281_v46 = vld [vmem:[%s1458_s11 + $0xf0] ss:$8 sps:$4 sm:$0xff]   ;;  %s1538_s11 = scalar_lea.vmem [#allocation2], %s1011_s10 }
  0x25   : > { %548 = vmatprep.subr.bf16.mxu0 %v1362_v1  ;;  %1151 = vmatprep.subr.bf16.mxu1 %v1362_v1  ;;  %s905_s19 = sshll.u32 %s1538_s11, 4  ;;  %s1631_s19 = int_to_ptr.vmem [resolvable:$true] %s905_s19 }
  0x26   : > { %s1282_s27 = scalar_lea.vmem %s1631_s19, 2048  ;;  %p1289_p1 = scmp.lt.s32.totalorder %s1631_s19, %s1287_s29 }
  0x27   : > { %p1283_p12 = scmp.ne.s32.totalorder %s1631_s19, %s1282_s27  ;;  %p1290_p2 = scmp.lt.s32.totalorder %s1288_s30, %s1282_s27 }
  0x28   : > { %549 = vmatpush1.bf16.msra.mxu0 %v1230_v9  ;;  %1161 = vmatpush1.bf16.msra.mxu1 %v1230_v9 }
  0x29   : > { %550 = vmatprep.subr.bf16.mxu0 %v1362_v1  ;;  %1152 = vmatprep.subr.bf16.mxu1 %v1362_v1  ;;  %p1284_p13 = pnand %p1283_p12, %p1427_p4  ;;  %p1291_p3 = por %p1290_p2, %p1289_p1 }
  0x2b   : > { %p1285_p0 = pneg %p1284_p13 }
  0x2c   : > { %551 = vmatpush1.bf16.msra.mxu0 %v1231_v10  ;;  %1162 = vmatpush1.bf16.msra.mxu1 %v1231_v10 }
  0x2d   : > { %552 = vmatprep.subr.bf16.mxu0 %v1362_v1  ;;  %1153 = vmatprep.subr.bf16.mxu1 %v1362_v1  ;;  %p1292_p5 = pnand %p1291_p3, %p1285_p0 }
  0x30   : > { %553 = vmatpush1.bf16.msra.mxu0 %v1232_v13  ;;  %1163 = vmatpush1.bf16.msra.mxu1 %v1232_v13 }
  0x31   : > { %554 = vmatprep.subr.bf16.mxu0 %v1362_v1  ;;  %1154 = vmatprep.subr.bf16.mxu1 %v1362_v1 }
  0x34   : > { %555 = vmatpush1.bf16.msra.mxu0 %v534_v16  ;;  %1164 = vmatpush1.bf16.msra.mxu1 %v534_v16 }
  0x37   : > { %569 = vmatmul.mubr.bf16.vlgmr.msra.gmra.mrb[0].mxu0 %v1234_v17  ;;  %633 = vmatmul.mubr.bf16.vlgmr.msra.gmra.mrb[0].mxu1 %v1237_v18 }
  0x38   : > { %1059 = vmatprep.mubr.msk.bf16.mxu0 %vm480_vm0, %v1240_v19  ;;  %1067 = vmatprep.mubr.msk.bf16.mxu1 %vm480_vm0, %v1242_v20 }
  0x3f   : > { %577 = vmatmul.mubr.bf16.gmra.mrb[4].mxu0 %v1244_v21  ;;  %641 = vmatmul.mubr.bf16.gmra.mrb[4].mxu1 %v1245_v22 }
  0x40   : > { %1060 = vmatprep.mubr.msk.bf16.mxu0 %vm480_vm0, %v1246_v23  ;;  %1068 = vmatprep.mubr.msk.bf16.mxu1 %vm480_vm0, %v1248_v24 }
  0x47   : > { %585 = vmatmul.mubr.bf16.gmra.mrb[8].mxu0 %v1250_v25  ;;  %649 = vmatmul.mubr.bf16.gmra.mrb[8].mxu1 %v1251_v26 }
  0x48   : > { %1061 = vmatprep.mubr.msk.bf16.mxu0 %vm480_vm0, %v1252_v27  ;;  %1069 = vmatprep.mubr.msk.bf16.mxu1 %vm480_vm0, %v1254_v28 }
  0x4f   : > { %593 = vmatmul.mubr.bf16.gmra.mrb[12].mxu0 %v1256_v29  ;;  %657 = vmatmul.mubr.bf16.gmra.mrb[12].mxu1 %v1257_v30 }
  0x50   : > { %1062 = vmatprep.mubr.msk.bf16.mxu0 %vm480_vm0, %v1258_v31  ;;  %1070 = vmatprep.mubr.msk.bf16.mxu1 %vm480_vm0, %v1260_v32 }
  0x57   : > { %601 = vmatmul.mubr.bf16.gmra.mrb[16].mxu0 %v1262_v33  ;;  %665 = vmatmul.mubr.bf16.gmra.mrb[16].mxu1 %v1263_v34 }
  0x58   : > { %1063 = vmatprep.mubr.msk.bf16.mxu0 %vm480_vm0, %v1264_v35  ;;  %1071 = vmatprep.mubr.msk.bf16.mxu1 %vm480_vm0, %v1266_v36 }
  0x5f   : > { %609 = vmatmul.mubr.bf16.gmra.mrb[20].mxu0 %v1268_v37  ;;  %673 = vmatmul.mubr.bf16.gmra.mrb[20].mxu1 %v1269_v38 }
  0x60   : > { %1064 = vmatprep.mubr.msk.bf16.mxu0 %vm480_vm0, %v1270_v39  ;;  %1072 = vmatprep.mubr.msk.bf16.mxu1 %vm480_vm0, %v1272_v40 }
  0x67   : > { %617 = vmatmul.mubr.bf16.gmra.mrb[24].mxu0 %v1274_v41  ;;  %681 = vmatmul.mubr.bf16.gmra.mrb[24].mxu1 %v1275_v42 }
  0x68   : > { %1065 = vmatprep.mubr.msk.bf16.mxu0 %vm480_vm0, %v1276_v43  ;;  %1073 = vmatprep.mubr.msk.bf16.mxu1 %vm480_vm0, %v1278_v44 }
  0x6f   : > { %625 = vmatmul.mubr.bf16.gmra.mrb[28].mxu0 %v1280_v45  ;;  %689 = vmatmul.mubr.bf16.gmra.mrb[28].mxu1 %v1281_v46 }
 0x10a   : > { %v570_v48 = vpop.f32.mrb[0].mxu0  ;;  %v634_v49 = vpop.f32.mrb[0].mxu1 }
 0x10b   : > { %v571_v50 = vadd.f32 %v1530_v47, %v570_v48  ;;  %v635_v51 = vadd.f32 %v1530_v47, %v634_v49  ;;  %v572_v52 = vpop.f32.mrb[1].mxu0  ;;  %v636_v53 = vpop.f32.mrb[1].mxu1 }
 0x10c   : > { %v573_v54 = vpop.f32.mrb[2].mxu0  ;;  %v637_v55 = vpop.f32.mrb[2].mxu1 }
 0x10d   : > { %v697_v56 = vmax.f32 %v571_v50, 0.0  ;;  %v713_v57 = vmax.f32 %v635_v51, 0.0  ;;  %v574_v58 = vadd.f32 %v1530_v47, %v573_v54  ;;  %v638_v59 = vadd.f32 %v1530_v47, %v637_v55  ;;  %v575_v60 = vpop.f32.mrb[3].mxu0  ;;  %v639_v61 = vpop.f32.mrb[3].mxu1 }
 0x10f   : > { %v1112_v62 = vpack.c.bf16 %v697_v56, %v697_v56  ;;  %v1128_v63 = vpack.c.bf16 %v713_v57, %v713_v57  ;;  %v698_v0 = vmax.f32 %v574_v58, 0.0  ;;  %v714_v1 = vmax.f32 %v638_v59, 0.0 }
 0x111   : > { %858 = vst.msk [vmem:[%s1538_s11] sm:$0xf] %vm857_vm3, %v1112_v62  ;;  %874 = vst.msk [vmem:[%s1538_s11 + $0x40] sm:$0xf] %vm857_vm3, %v1128_v63  ;;  %v1113_v2 = vpack.c.bf16 %v698_v0, %v698_v0  ;;  %v1129_v3 = vpack.c.bf16 %v714_v1, %v714_v1 }
 0x112   : > { %v578_v4 = vpop.f32.mrb[4].mxu0  ;;  %v642_v5 = vpop.f32.mrb[4].mxu1 }
 0x113   : > { %859 = vst.msk [vmem:[%s1538_s11 + $0x4] sm:$0xf] %vm857_vm3, %v1113_v2  ;;  %875 = vst.msk [vmem:[%s1538_s11 + $0x44] sm:$0xf] %vm857_vm3, %v1129_v3  ;;  %v579_v6 = vadd.f32 %v1530_v47, %v578_v4  ;;  %v643_v7 = vadd.f32 %v1530_v47, %v642_v5  ;;  %v580_v8 = vpop.f32.mrb[5].mxu0  ;;  %v644_v9 = vpop.f32.mrb[5].mxu1 }
 0x114   : > { %v581_v10 = vpop.f32.mrb[6].mxu0  ;;  %v645_v11 = vpop.f32.mrb[6].mxu1 }
 0x115   : > { %v699_v12 = vmax.f32 %v579_v6, 0.0  ;;  %v715_v13 = vmax.f32 %v643_v7, 0.0  ;;  %v582_v14 = vadd.f32 %v1530_v47, %v581_v10  ;;  %v646_v15 = vadd.f32 %v1530_v47, %v645_v11  ;;  %v583_v16 = vpop.f32.mrb[7].mxu0  ;;  %v647_v17 = vpop.f32.mrb[7].mxu1 }
 0x117   : > { %v1114_v18 = vpack.c.bf16 %v699_v12, %v699_v12  ;;  %v1130_v19 = vpack.c.bf16 %v715_v13, %v715_v13  ;;  %v700_v20 = vmax.f32 %v582_v14, 0.0  ;;  %v716_v21 = vmax.f32 %v646_v15, 0.0 }
 0x119   : > { %860 = vst.msk [vmem:[%s1538_s11 + $0x8] sm:$0xf] %vm857_vm3, %v1114_v18  ;;  %876 = vst.msk [vmem:[%s1538_s11 + $0x48] sm:$0xf] %vm857_vm3, %v1130_v19  ;;  %v1115_v22 = vpack.c.bf16 %v700_v20, %v700_v20  ;;  %v1131_v23 = vpack.c.bf16 %v716_v21, %v716_v21 }
 0x11a   : > { %v586_v24 = vpop.f32.mrb[8].mxu0  ;;  %v650_v25 = vpop.f32.mrb[8].mxu1 }
 0x11b   : > { %861 = vst.msk [vmem:[%s1538_s11 + $0xc] sm:$0xf] %vm857_vm3, %v1115_v22  ;;  %877 = vst.msk [vmem:[%s1538_s11 + $0x4c] sm:$0xf] %vm857_vm3, %v1131_v23  ;;  %v587_v26 = vadd.f32 %v1530_v47, %v586_v24  ;;  %v651_v27 = vadd.f32 %v1530_v47, %v650_v25  ;;  %v588_v28 = vpop.f32.mrb[9].mxu0  ;;  %v652_v29 = vpop.f32.mrb[9].mxu1 }
 0x11c   : > { %v589_v30 = vpop.f32.mrb[10].mxu0  ;;  %v653_v31 = vpop.f32.mrb[10].mxu1 }
 0x11d   : > { %v701_v32 = vmax.f32 %v587_v26, 0.0  ;;  %v717_v33 = vmax.f32 %v651_v27, 0.0  ;;  %v590_v34 = vadd.f32 %v1530_v47, %v589_v30  ;;  %v654_v35 = vadd.f32 %v1530_v47, %v653_v31  ;;  %v591_v36 = vpop.f32.mrb[11].mxu0  ;;  %v655_v37 = vpop.f32.mrb[11].mxu1 }
 0x11f   : > { %v1116_v38 = vpack.c.bf16 %v701_v32, %v701_v32  ;;  %v1132_v39 = vpack.c.bf16 %v717_v33, %v717_v33  ;;  %v702_v40 = vmax.f32 %v590_v34, 0.0  ;;  %v718_v41 = vmax.f32 %v654_v35, 0.0 }
 0x121   : > { %862 = vst.msk [vmem:[%s1538_s11 + $0x10] sm:$0xf] %vm857_vm3, %v1116_v38  ;;  %878 = vst.msk [vmem:[%s1538_s11 + $0x50] sm:$0xf] %vm857_vm3, %v1132_v39  ;;  %v1117_v42 = vpack.c.bf16 %v702_v40, %v702_v40  ;;  %v1133_v43 = vpack.c.bf16 %v718_v41, %v718_v41 }
 0x122   : > { %v594_v44 = vpop.f32.mrb[12].mxu0  ;;  %v658_v45 = vpop.f32.mrb[12].mxu1 }
 0x123   : > { %863 = vst.msk [vmem:[%s1538_s11 + $0x14] sm:$0xf] %vm857_vm3, %v1117_v42  ;;  %879 = vst.msk [vmem:[%s1538_s11 + $0x54] sm:$0xf] %vm857_vm3, %v1133_v43  ;;  %v595_v46 = vadd.f32 %v1530_v47, %v594_v44  ;;  %v659_v48 = vadd.f32 %v1530_v47, %v658_v45  ;;  %v596_v49 = vpop.f32.mrb[13].mxu0  ;;  %v660_v50 = vpop.f32.mrb[13].mxu1 }
 0x124   : > { %v597_v51 = vpop.f32.mrb[14].mxu0  ;;  %v661_v52 = vpop.f32.mrb[14].mxu1 }
 0x125   : > { %v703_v53 = vmax.f32 %v595_v46, 0.0  ;;  %v719_v54 = vmax.f32 %v659_v48, 0.0  ;;  %v598_v55 = vadd.f32 %v1530_v47, %v597_v51  ;;  %v662_v56 = vadd.f32 %v1530_v47, %v661_v52  ;;  %v599_v57 = vpop.f32.mrb[15].mxu0  ;;  %v663_v58 = vpop.f32.mrb[15].mxu1 }
 0x127   : > { %v1118_v59 = vpack.c.bf16 %v703_v53, %v703_v53  ;;  %v1134_v60 = vpack.c.bf16 %v719_v54, %v719_v54  ;;  %v704_v61 = vmax.f32 %v598_v55, 0.0  ;;  %v720_v62 = vmax.f32 %v662_v56, 0.0 }
 0x129   : > { %864 = vst.msk [vmem:[%s1538_s11 + $0x18] sm:$0xf] %vm857_vm3, %v1118_v59  ;;  %880 = vst.msk [vmem:[%s1538_s11 + $0x58] sm:$0xf] %vm857_vm3, %v1134_v60  ;;  %v1119_v63 = vpack.c.bf16 %v704_v61, %v704_v61  ;;  %v1135_v0 = vpack.c.bf16 %v720_v62, %v720_v62 }
 0x12a   : > { %v602_v1 = vpop.f32.mrb[16].mxu0  ;;  %v666_v2 = vpop.f32.mrb[16].mxu1 }
 0x12b   : > { %865 = vst.msk [vmem:[%s1538_s11 + $0x1c] sm:$0xf] %vm857_vm3, %v1119_v63  ;;  %881 = vst.msk [vmem:[%s1538_s11 + $0x5c] sm:$0xf] %vm857_vm3, %v1135_v0  ;;  %v603_v3 = vadd.f32 %v1530_v47, %v602_v1  ;;  %v667_v4 = vadd.f32 %v1530_v47, %v666_v2  ;;  %v604_v5 = vpop.f32.mrb[17].mxu0  ;;  %v668_v6 = vpop.f32.mrb[17].mxu1 }
 0x12c   : > { %v605_v7 = vpop.f32.mrb[18].mxu0  ;;  %v669_v8 = vpop.f32.mrb[18].mxu1 }
 0x12d   : > { %v705_v9 = vmax.f32 %v603_v3, 0.0  ;;  %v721_v10 = vmax.f32 %v667_v4, 0.0  ;;  %v606_v11 = vadd.f32 %v1530_v47, %v605_v7  ;;  %v670_v12 = vadd.f32 %v1530_v47, %v669_v8  ;;  %v607_v13 = vpop.f32.mrb[19].mxu0  ;;  %v671_v14 = vpop.f32.mrb[19].mxu1 }
 0x12f   : > { %v1120_v15 = vpack.c.bf16 %v705_v9, %v705_v9  ;;  %v1136_v16 = vpack.c.bf16 %v721_v10, %v721_v10  ;;  %v706_v17 = vmax.f32 %v606_v11, 0.0  ;;  %v722_v18 = vmax.f32 %v670_v12, 0.0 }
 0x131   : > { %866 = vst.msk [vmem:[%s1538_s11 + $0x20] sm:$0xf] %vm857_vm3, %v1120_v15  ;;  %882 = vst.msk [vmem:[%s1538_s11 + $0x60] sm:$0xf] %vm857_vm3, %v1136_v16  ;;  %v1121_v19 = vpack.c.bf16 %v706_v17, %v706_v17  ;;  %v1137_v20 = vpack.c.bf16 %v722_v18, %v722_v18 }
 0x132   : > { %v610_v21 = vpop.f32.mrb[20].mxu0  ;;  %v674_v22 = vpop.f32.mrb[20].mxu1 }
 0x133   : > { %867 = vst.msk [vmem:[%s1538_s11 + $0x24] sm:$0xf] %vm857_vm3, %v1121_v19  ;;  %883 = vst.msk [vmem:[%s1538_s11 + $0x64] sm:$0xf] %vm857_vm3, %v1137_v20  ;;  %v611_v23 = vadd.f32 %v1530_v47, %v610_v21  ;;  %v675_v24 = vadd.f32 %v1530_v47, %v674_v22  ;;  %v612_v25 = vpop.f32.mrb[21].mxu0  ;;  %v676_v26 = vpop.f32.mrb[21].mxu1 }
 0x134   : > { %v613_v27 = vpop.f32.mrb[22].mxu0  ;;  %v677_v28 = vpop.f32.mrb[22].mxu1 }
 0x135   : > { %v707_v29 = vmax.f32 %v611_v23, 0.0  ;;  %v723_v30 = vmax.f32 %v675_v24, 0.0  ;;  %v614_v31 = vadd.f32 %v1530_v47, %v613_v27  ;;  %v678_v32 = vadd.f32 %v1530_v47, %v677_v28  ;;  %v615_v33 = vpop.f32.mrb[23].mxu0  ;;  %v679_v34 = vpop.f32.mrb[23].mxu1 }
 0x137   : > { %v1122_v35 = vpack.c.bf16 %v707_v29, %v707_v29  ;;  %v1138_v36 = vpack.c.bf16 %v723_v30, %v723_v30  ;;  %v708_v37 = vmax.f32 %v614_v31, 0.0  ;;  %v724_v38 = vmax.f32 %v678_v32, 0.0 }
 0x139   : > { %868 = vst.msk [vmem:[%s1538_s11 + $0x28] sm:$0xf] %vm857_vm3, %v1122_v35  ;;  %884 = vst.msk [vmem:[%s1538_s11 + $0x68] sm:$0xf] %vm857_vm3, %v1138_v36  ;;  %v1123_v39 = vpack.c.bf16 %v708_v37, %v708_v37  ;;  %v1139_v40 = vpack.c.bf16 %v724_v38, %v724_v38 }
 0x13a   : > { %v618_v41 = vpop.f32.mrb[24].mxu0  ;;  %v682_v42 = vpop.f32.mrb[24].mxu1 }
 0x13b   : > { %869 = vst.msk [vmem:[%s1538_s11 + $0x2c] sm:$0xf] %vm857_vm3, %v1123_v39  ;;  %885 = vst.msk [vmem:[%s1538_s11 + $0x6c] sm:$0xf] %vm857_vm3, %v1139_v40  ;;  %v619_v43 = vadd.f32 %v1530_v47, %v618_v41  ;;  %v683_v44 = vadd.f32 %v1530_v47, %v682_v42  ;;  %v620_v45 = vpop.f32.mrb[25].mxu0  ;;  %v684_v46 = vpop.f32.mrb[25].mxu1 }
 0x13c   : > { %v621_v48 = vpop.f32.mrb[26].mxu0  ;;  %v685_v49 = vpop.f32.mrb[26].mxu1 }
 0x13d   : > { %v709_v50 = vmax.f32 %v619_v43, 0.0  ;;  %v725_v51 = vmax.f32 %v683_v44, 0.0  ;;  %v622_v52 = vadd.f32 %v1530_v47, %v621_v48  ;;  %v686_v53 = vadd.f32 %v1530_v47, %v685_v49  ;;  %v623_v54 = vpop.f32.mrb[27].mxu0  ;;  %v687_v55 = vpop.f32.mrb[27].mxu1 }
 0x13f   : > { %v1124_v56 = vpack.c.bf16 %v709_v50, %v709_v50  ;;  %v1140_v57 = vpack.c.bf16 %v725_v51, %v725_v51  ;;  %v710_v58 = vmax.f32 %v622_v52, 0.0  ;;  %v726_v59 = vmax.f32 %v686_v53, 0.0 }
 0x141   : > { %870 = vst.msk [vmem:[%s1538_s11 + $0x30] sm:$0xf] %vm857_vm3, %v1124_v56  ;;  %886 = vst.msk [vmem:[%s1538_s11 + $0x70] sm:$0xf] %vm857_vm3, %v1140_v57  ;;  %v1125_v60 = vpack.c.bf16 %v710_v58, %v710_v58  ;;  %v1141_v61 = vpack.c.bf16 %v726_v59, %v726_v59 }
 0x142   : > { %v626_v62 = vpop.f32.mrb[28].mxu0  ;;  %v690_v63 = vpop.f32.mrb[28].mxu1 }
 0x143   : > { %871 = vst.msk [vmem:[%s1538_s11 + $0x34] sm:$0xf] %vm857_vm3, %v1125_v60  ;;  %887 = vst.msk [vmem:[%s1538_s11 + $0x74] sm:$0xf] %vm857_vm3, %v1141_v61  ;;  %v627_v0 = vadd.f32 %v1530_v47, %v626_v62  ;;  %v691_v1 = vadd.f32 %v1530_v47, %v690_v63  ;;  %v628_v2 = vpop.f32.mrb[29].mxu0  ;;  %v692_v3 = vpop.f32.mrb[29].mxu1 }
 0x144   : > { %v629_v4 = vpop.f32.mrb[30].mxu0  ;;  %v693_v5 = vpop.f32.mrb[30].mxu1 }
 0x145   : > { %v711_v6 = vmax.f32 %v627_v0, 0.0  ;;  %v727_v7 = vmax.f32 %v691_v1, 0.0  ;;  %v630_v8 = vadd.f32 %v1530_v47, %v629_v4  ;;  %v694_v9 = vadd.f32 %v1530_v47, %v693_v5  ;;  %v631_v10 = vpop.f32.mrb[31].mxu0  ;;  %v695_v11 = vpop.f32.mrb[31].mxu1 }
 0x147   : > { %v1126_v12 = vpack.c.bf16 %v711_v6, %v711_v6  ;;  %v1142_v13 = vpack.c.bf16 %v727_v7, %v727_v7  ;;  %v712_v14 = vmax.f32 %v630_v8, 0.0  ;;  %v728_v15 = vmax.f32 %v694_v9, 0.0 }
 0x149   : > { %872 = vst.msk [vmem:[%s1538_s11 + $0x38] sm:$0xf] %vm857_vm3, %v1126_v12  ;;  %888 = vst.msk [vmem:[%s1538_s11 + $0x78] sm:$0xf] %vm857_vm3, %v1142_v13  ;;  %v1127_v47 = vpack.c.bf16 %v712_v14, %v712_v14  ;;  %v1143_v16 = vpack.c.bf16 %v728_v15, %v728_v15 }
 0x14b   : > { %873 = vst.msk [vmem:[%s1538_s11 + $0x3c] sm:$0xf] %vm857_vm3, %v1127_v47  ;;  %889 = vst.msk [vmem:[%s1538_s11 + $0x7c] sm:$0xf] %vm857_vm3, %v1143_v16 }
 0x14c   : > { %1295 = shalt.err (!%p1292_p5)
}
 0x14d   : > { %s1296_s4 = scalar_lea.hbm %s1629_s26, 2048  ;;  %s1300_s7 = scalar_lea.hbm %s1692_s3, 16384 }
 0x14e   : > { %p1297_p6 = scmp.ne.s32.totalorder %s1629_s26, %s1296_s4  ;;  %p1301_p10 = scmp.lt.u32.totalorder %s1629_s26, %s1692_s3 }
 0x14f   : > { %p1302_p11 = scmp.lt.u32.totalorder %s1300_s7, %s1296_s4  ;;  %p1304_p13 = scmp.lt.u32.totalorder %s1296_s4, %s1629_s26 }
 0x150   : > { %p1298_p7 = pnand %p1297_p6, %p1427_p4 }
 0x151   : > { %p1303_p12 = por %p1302_p11, %p1301_p10 }
 0x152   : > { %p1299_p9 = pneg %p1298_p7 }
 0x153   : > { %p1305_p0 = por %p1304_p13, %p1303_p12 }
 0x155   : > { %p1306_p1 = pnand %p1305_p0, %p1299_p9 }
 0x157   : > { %1309 = shalt.err (!%p1306_p1)
}
 0x158   : > { %s1365_s10 = smov 64   ;;  %s1366_s11 = smov 4  }
 0x159   : > { %1165 = dma.vmem_to_hbm [thread:$0]  (%p1427_p4), %s1631_s19, 2048, %s1629_s26, %s1643_s15, %s1365_s10, %s1365_s10, %s1366_s11  }
 0x15a PF: > { %p1171_p2 = scmp.ge.s32.totalorder %s1360_s17, 2  ;;  %s920_s18 = sand.u32 1, %s1340_s12  }
 0x15b   : > { %s921_s21 = scalar_lea.sflag [#allocation3], %s920_s18 }
 0x15c   : > { %p1168_p3 = pnand %p1171_p2, %p1434_p8 }
 0x15e   : > { %1335 = dma.done.wait (!%p1168_p3), %s921_s21, 2048  }
 0x15f   : > { %1337 = vsyncadd (!%p1168_p3), %s921_s21, 4294965248  ;;  %s16_s17 = sadd.s32 1, %s1360_s17   ;;  %s1695_s12 = smov %s1344_s13 }
 0x160   : > { %p13_p5 = scmp.ge.s32.totalorder %s16_s17, 10   ;;  %s1696_s13 = smov %s1348_s14 }
 0x161   : > { %s1697_s14 = smov %s1440_s25  ;;  %s1698_s15 = smov %s1356_s16 }
 0x162   : > { %s1699_s16 = smov %s1701_s20  ;;  %15 = sbr.rel (!%p13_p5) target bundleno = 4 (0x4), region = 73 }
 0x169   :  { %926 = vsyncpa [#allocation3], 1 }
 0x16a   :  { %928 = vsyncpa [#allocation3 + $0x1], 1 }

</bundles_post_ra>
